<compile_context>
chip_gen: v7x
topology: tpu7x:2x2x1
jax: 0.10.0
libtpu: 0.0.40
codegen_flags: <defaults>
</compile_context>

<pallas_src>
import numpy as np
import jax
import jax.numpy as jnp
from jax.experimental import pallas as pl
from jax.experimental.pallas import tpu as pltpu

# ---- Spectrogram constants (match torchaudio.transforms.Spectrogram args used) ----
N_FFT = 512
WIN_LENGTH = 128
HOP = 50
N_BINS_FULL = N_FFT // 2 + 1                      # 257 (onesided)
N_BINS = int(20 / 100 * N_BINS_FULL + 2)          # 53  (== the torch crop `[:, :, :53, :]`)
HALF = 64                                         # per-half lane width of fused RHS
TM = 256                                          # frame rows per grid step (MXU-friendly)
SCALE = 1.0 / 1000.0                              # folded into the DFT matrices


def _dft_matrix_fused():
    """Fused windowed real-DFT RHS: (512, 128) bf16 = [cos*win*1e-3 | -sin*win*1e-3],
    each half zero-padded from 53 to 64 columns."""
    n = np.arange(N_FFT)
    k = np.arange(N_BINS)
    # torch.hann_window(128) (periodic=True): 0.5 - 0.5*cos(2*pi*n/128)
    win = 0.5 - 0.5 * np.cos(2 * np.pi * np.arange(WIN_LENGTH) / WIN_LENGTH)
    # torch.stft zero-pads the window to n_fft, centered
    pad_l = (N_FFT - WIN_LENGTH) // 2
    win_full = np.zeros(N_FFT, dtype=np.float64)
    win_full[pad_l:pad_l + WIN_LENGTH] = win
    ang = 2.0 * np.pi * np.outer(n, k) / N_FFT    # (512, 53)
    cos_m = SCALE * win_full[:, None] * np.cos(ang)
    sin_m = -SCALE * win_full[:, None] * np.sin(ang)
    rhs = np.zeros((N_FFT, 2 * HALF), dtype=np.float32)
    rhs[:, :N_BINS] = cos_m
    rhs[:, HALF:HALF + N_BINS] = sin_m
    return jnp.asarray(rhs, dtype=jnp.bfloat16)


def _spec_kernel(frames_ref, dft_ref, out_ref):
    # frames_ref: (TM, 512) bf16, dft_ref: (512, 128) bf16 (constant across grid),
    # out_ref: (TM, 128) f32 (lane-dense; only lanes 0..52 are consumed downstream).
    reim = jnp.dot(frames_ref[...], dft_ref[...],
                   preferred_element_type=jnp.float32)          # (TM, 128) f32
    sq = reim * reim
    # Combine re^2 (lanes 0..63) with im^2 (lanes 64..127) via an XLU lane rotation.
    power = sq + pltpu.roll(sq, shift=HALF, axis=1)
    # Original: clip(mag, 0, 10000) / 1000; scale already folded -> clip(mag_scaled, 0, 10)
    out_ref[...] = jnp.clip(jnp.sqrt(power), 0.0, 10.0)


def transform_forward(x):
    """x: (B, 2, T) float32 waveform -> (B, 3, 53, 2*F) where F = 1 + T // HOP."""
    B, C, T = x.shape
    x = x.astype(jnp.float32)
    # center=True reflect padding of n_fft//2 on each side (torch.stft default)
    x_pad = jnp.pad(x, ((0, 0), (0, 0), (N_FFT // 2, N_FFT // 2)), mode="reflect")
    # cast before the frame gather: halves the gathered HBM bytes, bf16-feeds the MXU
    x_pad = x_pad.astype(jnp.bfloat16)
    F = 1 + T // HOP
    # frame extraction (strided gather) — glue, not the hot path
    idx = jnp.arange(F)[:, None] * HOP + jnp.arange(N_FFT)[None, :]
    frames = x_pad[..., idx]                      # (B, C, F, 512) bf16
    frames = frames.reshape(B * C * F, N_FFT)

    M = frames.shape[0]
    M_pad = pl.cdiv(M, TM) * TM
    frames = jnp.pad(frames, ((0, M_pad - M), (0, 0)))

    dft = _dft_matrix_fused()

    out = pl.pallas_call(
        _spec_kernel,
        out_shape=jax.ShapeDtypeStruct((M_pad, 2 * HALF), jnp.float32),
        grid_spec=pltpu.PrefetchScalarGridSpec(
            num_scalar_prefetch=0,
            grid=(M_pad // TM,),
            in_specs=[
                pl.BlockSpec((TM, N_FFT), lambda i: (i, 0)),
                # constant index_map -> fetched once, reused across all grid steps
                pl.BlockSpec((N_FFT, 2 * HALF), lambda i: (0, 0)),
            ],
            out_specs=pl.BlockSpec((TM, 2 * HALF), lambda i: (i, 0)),
        ),
        compiler_params=pltpu.CompilerParams(dimension_semantics=("parallel",)),
    )(frames, dft)

    # crop to the 53 real bins, back to torch spectrogram layout (n, c, freq, frames)
    spec = out[:M, :N_BINS].reshape(B, C, F, N_BINS)    # (B, C, time, freq)
    image = jnp.transpose(spec, (0, 1, 3, 2))           # (B, C, 53, F)

    n, c, h, w = image.shape
    image = image.reshape(n, 2, -1, w)                  # identity for c == 2
    x1 = image[:, 0:1, ...]
    x2 = image[:, 1:2, ...]
    image = jnp.concatenate([x1, x2], axis=-1)          # (n, 1, 53, 2*F)
    image = jnp.concatenate([image, image, image], axis=1)  # (n, 3, 53, 2*F)
    return image


if __name__ == "__main__":
    key = jax.random.PRNGKey(0)
    # small but consistent with the module: stereo waveform, 400 samples (>= 257 for reflect pad)
    x = jax.random.normal(key, (2, 2, 400), dtype=jnp.float32)
    out = transform_forward(x)
    out = jax.block_until_ready(out)
    F = 1 + 400 // HOP
    assert out.shape == (2, 3, N_BINS, 2 * F), out.shape
    assert out.dtype == jnp.float32
    print("KERNEL_OK")
</pallas_src>

<mosaic_0001>
module attributes {stable_mosaic.version = 11 : i64} {
  func.func @_spec_kernel(%arg0: i32, %arg1: memref<256x512xbf16, #tpu.memory_space<vmem>>, %arg2: memref<512x128xbf16, #tpu.memory_space<vmem>>, %arg3: memref<256x128xf32, #tpu.memory_space<vmem>>) attributes {dimension_semantics = [#tpu.dimension_semantics<parallel>], iteration_bounds = array<i64: 1>, scalar_prefetch = 0 : i64, scratch_operands = 0 : i64, tpu.core_type = #tpu.core_type<tc>, window_params = [{transform_indices = @transform_0, window_bounds = array<i64: 256, 512>}, {pipeline_mode = #tpu.pipeline_mode<synchronous>, transform_indices = @transform_1, window_bounds = array<i64: 512, 128>}, {transform_indices = @transform_2, window_bounds = array<i64: 256, 128>}]} {
    %c0 = arith.constant 0 : index
    %c0_0 = arith.constant 0 : index
    %0 = vector.load %arg1[%c0, %c0_0] : memref<256x512xbf16, #tpu.memory_space<vmem>>, vector<256x512xbf16>
    %c0_1 = arith.constant 0 : index
    %c0_2 = arith.constant 0 : index
    %1 = vector.load %arg2[%c0_1, %c0_2] : memref<512x128xbf16, #tpu.memory_space<vmem>>, vector<512x128xbf16>
    %cst = arith.constant dense<0.000000e+00> : vector<256x128xf32>
    %2 = tpu.matmul %0, %1, %cst {dimension_numbers = #tpu.dot_dimension_numbers<[1], [0], [0], [1], [0, 0, 1, 1], [], []>} : vector<256x512xbf16>, vector<512x128xbf16>, vector<256x128xf32> -> vector<256x128xf32>
    %3 = arith.mulf %2, %2 : vector<256x128xf32>
    %c64_i32 = arith.constant 64 : i32
    %4 = tpu.dynamic_rotate %3 by %c64_i32 dim 1 : vector<256x128xf32>, i32 -> vector<256x128xf32>
    %5 = arith.addf %3, %4 : vector<256x128xf32>
    %6 = math.sqrt %5 : vector<256x128xf32>
    %cst_3 = arith.constant 0.000000e+00 : f32
    %cst_4 = arith.constant 1.000000e+01 : f32
    %7 = vector.broadcast %cst_3 : f32 to vector<256x128xf32>
    %8 = arith.maximumf %7, %6 : vector<256x128xf32>
    %9 = vector.broadcast %cst_4 : f32 to vector<256x128xf32>
    %10 = arith.minimumf %9, %8 : vector<256x128xf32>
    %c0_5 = arith.constant 0 : index
    %c0_6 = arith.constant 0 : index
    %11 = vector.load %arg3[%c0_5, %c0_6] : memref<256x128xf32, #tpu.memory_space<vmem>>, vector<256x128xf32>
    tpu.vector_store %arg3[%c0_5, %c0_6], %10 {strides = array<i32>} : memref<256x128xf32, #tpu.memory_space<vmem>>, vector<256x128xf32>,
    return
  }
  func.func @transform_0(%arg0: i32) -> (i32, i32) {
    %c0_i32 = arith.constant 0 : i32
    %c0_i32_0 = arith.constant 0 : i32
    return %arg0, %c0_i32 : i32, i32
  }
  func.func @transform_1(%arg0: i32) -> (i32, i32) {
    %c0_i32 = arith.constant 0 : i32
    %c0_i32_0 = arith.constant 0 : i32
    %c0_i32_1 = arith.constant 0 : i32
    return %c0_i32, %c0_i32_0 : i32, i32
  }
  func.func @transform_2(%arg0: i32) -> (i32, i32) {
    %c0_i32 = arith.constant 0 : i32
    %c0_i32_0 = arith.constant 0 : i32
    return %arg0, %c0_i32 : i32, i32
  }
}

</mosaic_0001>

<bundles_post_ra>
// kernel: tpu_custom_call.1
= control target key start
LH: loop header
LB: loop body
LE: loop exit
PB: predicated region body
PF: predicated region fallthrough
CT: control target
= control target key end

     0   :  { %7 = vsyncpa [#allocation3], 0  ;;  %s2284_s0 = inlined_call_operand.hbm [shape: bf16[256,512], index: 0, kind: input, shape index: {}]   ;;  %s2285_s1 = inlined_call_operand.hbm [shape: bf16[512,128], index: 1, kind: input, shape index: {}]   ;;  %s2286_s2 = inlined_call_operand.hbm [shape: f32[256,128], index: 2, kind: output, shape index: {}]  }
   0x1   :  { %8 = vsyncpa [#allocation6], 0 }
   0x2   :  { %9 = vsyncpa [#allocation4], 0  ;;  %s2062_s9 = smov [#allocation2]   ;;  %s1990_s13 = scalar_lea.hbm %s2284_s0, 8192 }
   0x3   :  { %s15_s10 = sshll.u32 %s2062_s9, 4  ;;  %p1991_p0 = scmp.ne.s32.totalorder %s2284_s0, %s1990_s13  ;;  %s16_s10 = int_to_ptr.vmem [resolvable:$true] %s15_s10 }
   0x4   :  { %p1994_p1 = scmp.lt.u32.totalorder %s1990_s13, %s2284_s0 }
   0x6   :  { %p1996_p2 = pnand %p1994_p1, %p1991_p0 }
   0x8   :  { %1999 = shalt.err (!%p1996_p2)
}
   0x9   :  { %s2000_s18 = scalar_lea.vmem %s16_s10, 8192  ;;  %p2005_p4 = scmp.lt.s32.totalorder %s16_s10, %s16_s10 }
   0xa   :  { %p2001_p3 = scmp.ne.s32.totalorder %s16_s10, %s2000_s18  ;;  %p2006_p5 = scmp.lt.s32.totalorder %s2000_s18, %s2000_s18 }
   0xc   :  { %p2007_p6 = por %p2006_p5, %p2005_p4 }
   0xe   :  { %p2008_p7 = pnand %p2007_p6, %p2001_p3 }
  0x10   :  { %2011 = shalt.err (!%p2008_p7)
}
  0x11   :  { %s2063_s19 = smov 256   ;;  %s2064_s20 = smov 16  }
  0x12   :  { %21 = dma.hbm_to_vmem [thread:$0]  %s2284_s0, 8192, %s16_s10, [#allocation3], %s2063_s19, %s2063_s19, %s2064_s20  }
  0x13   :  { %s2065_s23 = smov [#allocation5]   ;;  %s2012_s27 = scalar_lea.hbm %s2285_s1, 4096 }
  0x14   :  { %s27_s24 = sshll.u32 %s2065_s23, 4  ;;  %p2013_p8 = scmp.ne.s32.totalorder %s2285_s1, %s2012_s27  ;;  %s28_s24 = int_to_ptr.vmem [resolvable:$true] %s27_s24 }
  0x15   :  { %p2016_p9 = scmp.lt.u32.totalorder %s2012_s27, %s2285_s1 }
  0x17   :  { %p2018_p10 = pnand %p2016_p9, %p2013_p8 }
  0x19   :  { %2021 = shalt.err (!%p2018_p10)
}
  0x1a   :  { %s2022_s4 = scalar_lea.vmem %s28_s24, 4096  ;;  %p2027_p12 = scmp.lt.s32.totalorder %s28_s24, %s28_s24 }
  0x1b   :  { %p2023_p11 = scmp.ne.s32.totalorder %s28_s24, %s2022_s4  ;;  %p2028_p13 = scmp.lt.s32.totalorder %s2022_s4, %s2022_s4 }
  0x1d   :  { %p2029_p0 = por %p2028_p13, %p2027_p12 }
  0x1f   :  { %p2030_p1 = pnand %p2029_p0, %p2023_p11 }
  0x21   :  { %2033 = shalt.err (!%p2030_p1)
}
  0x22   :  { %s2066_s0 = smov 64   ;;  %s2067_s5 = smov 4  }
  0x23   :  { %33 = dma.hbm_to_vmem [thread:$0]  %s2285_s1, 4096, %s28_s24, [#allocation6], %s2066_s0, %s2066_s0, %s2067_s5  }
  0x24   :  { %2056 = dma.done.wait [#allocation3], 8192  }
  0x25   :  { %2057 = vsyncadd [#allocation3], 4294959104 }
  0x26   :  { %2058 = dma.done.wait [#allocation6], 4096  }
  0x27   :  { %2059 = vsyncadd [#allocation6], 4294963200  ;;  %v1798_v0 = vld [vmem:[#allocation5 + $0x40] sm:$0xff]   ;;  %v1802_v4 = vld [vmem:[#allocation5 + $0x48] sm:$0xff]   ;;  %s2068_s1 = smov [#allocation7]  }
  0x28   :  { %v1799_v1 = vld [vmem:[#allocation5 + $0xc0] sm:$0xff]   ;;  %1565 = vmatprep.subr.bf16.mxu0 %v1798_v0  ;;  %v1803_v5 = vld [vmem:[#allocation5 + $0xc8] sm:$0xff]   ;;  %v1806_v8 = vld [vmem:[#allocation5 + $0x50] sm:$0xff]   ;;  %s1456_s8 = sshll.u32 %s2068_s1, 4  ;;  %s1457_s8 = int_to_ptr.vmem [resolvable:$true] %s1456_s8 }
  0x29   :  { %v1800_v2 = vld [vmem:[#allocation5] sm:$0xff]   ;;  %1677 = vmatprep.subr.bf16.mxu1 %v1799_v1  ;;  %v1804_v6 = vld [vmem:[#allocation5 + $0x8] sm:$0xff]   ;;  %v1807_v9 = vld [vmem:[#allocation5 + $0xd0] sm:$0xff]   ;;  %s2034_s9 = scalar_lea.vmem %s1457_s8, 4096  ;;  %p2039_p3 = scmp.lt.s32.totalorder %s1457_s8, %s1457_s8 }
  0x2a   :  { %v1801_v3 = vld [vmem:[#allocation5 + $0x80] sm:$0xff]   ;;  %1566 = vmatpush3.bf16.msra.mxu0 %v1800_v2  ;;  %v1805_v7 = vld [vmem:[#allocation5 + $0x88] sm:$0xff]   ;;  %v1808_v10 = vld [vmem:[#allocation5 + $0x10] sm:$0xff]   ;;  %p2035_p2 = scmp.ne.s32.totalorder %s1457_s8, %s2034_s9  ;;  %p2040_p4 = scmp.lt.s32.totalorder %s2034_s9, %s2034_s9 }
  0x2b   :  { %1678 = vmatpush3.bf16.msra.mxu1 %v1801_v3  ;;  %1567 = vmatprep.subr.bf16.mxu0 %v1802_v4  ;;  %v1809_v11 = vld [vmem:[#allocation5 + $0x90] sm:$0xff]   ;;  %v1810_v12 = vld [vmem:[#allocation5 + $0x58] sm:$0xff]   ;;  %v1814_v16 = vld [vmem:[#allocation5 + $0x60] sm:$0xff]  }
  0x2c   :  { %1679 = vmatprep.subr.bf16.mxu1 %v1803_v5  ;;  %v1811_v13 = vld [vmem:[#allocation5 + $0xd8] sm:$0xff]   ;;  %v1815_v17 = vld [vmem:[#allocation5 + $0xe0] sm:$0xff]   ;;  %v1818_v20 = vld [vmem:[#allocation5 + $0x68] sm:$0xff]   ;;  %p2041_p5 = por %p2040_p4, %p2039_p3 }
  0x2d   :  { %v1812_v14 = vld [vmem:[#allocation5 + $0x18] sm:$0xff]   ;;  %v1816_v18 = vld [vmem:[#allocation5 + $0x20] sm:$0xff]   ;;  %v1819_v21 = vld [vmem:[#allocation5 + $0xe8] sm:$0xff]  }
  0x2e   :  { %1568 = vmatpush3.bf16.msra.mxu0 %v1804_v6  ;;  %v1813_v15 = vld [vmem:[#allocation5 + $0x98] sm:$0xff]   ;;  %v1817_v19 = vld [vmem:[#allocation5 + $0xa0] sm:$0xff]   ;;  %v1820_v22 = vld [vmem:[#allocation5 + $0x28] sm:$0xff]   ;;  %p2042_p6 = pnand %p2041_p5, %p2035_p2 }
  0x2f   :  { %1680 = vmatpush3.bf16.msra.mxu1 %v1805_v7  ;;  %1569 = vmatprep.subr.bf16.mxu0 %v1806_v8  ;;  %v1821_v23 = vld [vmem:[#allocation5 + $0xa8] sm:$0xff]   ;;  %v1822_v24 = vld [vmem:[#allocation5 + $0x70] sm:$0xff]   ;;  %v1826_v28 = vld [vmem:[#allocation5 + $0x78] sm:$0xff]  }
  0x30   :  { %1681 = vmatprep.subr.bf16.mxu1 %v1807_v9  ;;  %v1823_v25 = vld [vmem:[#allocation5 + $0xf0] sm:$0xff]   ;;  %v1827_v29 = vld [vmem:[#allocation5 + $0xf8] sm:$0xff]  }
  0x31   :  { %v1824_v26 = vld [vmem:[#allocation5 + $0x30] sm:$0xff]   ;;  %v1828_v30 = vld [vmem:[#allocation5 + $0x38] sm:$0xff]  }
  0x32   :  { %1570 = vmatpush3.bf16.msra.mxu0 %v1808_v10  ;;  %v1825_v27 = vld [vmem:[#allocation5 + $0xb0] sm:$0xff]   ;;  %v1829_v31 = vld [vmem:[#allocation5 + $0xb8] sm:$0xff]  }
  0x33   :  { %1682 = vmatpush3.bf16.msra.mxu1 %v1809_v11  ;;  %1571 = vmatprep.subr.bf16.mxu0 %v1810_v12  ;;  %v1830_v32 = vld [vmem:[#allocation2] ss:$16 sps:$4 sm:$0xff]   ;;  %v1832_v33 = vld [vmem:[#allocation2 + $0x4] ss:$16 sps:$4 sm:$0xff]   ;;  %v1833_v34 = vld [vmem:[#allocation2 + $0x8] ss:$16 sps:$4 sm:$0xff]  }
  0x34   :  { %1683 = vmatprep.subr.bf16.mxu1 %v1811_v13  ;;  %v1835_v35 = vld [vmem:[#allocation2 + $0xc] ss:$16 sps:$4 sm:$0xff]   ;;  %713 = vmatprep.mubr.bf16.mxu0 %v1832_v33  ;;  %v1836_v36 = vld [vmem:[#allocation2 + $0x24] ss:$16 sps:$4 sm:$0xff]   ;;  %v1840_v38 = vld [vmem:[#allocation2 + $0x20] ss:$16 sps:$4 sm:$0xff]  }
  0x35   :  { %874 = vmatprep.mubr.bf16.mxu1 %v1835_v35  ;;  %v1838_v37 = vld [vmem:[#allocation2 + $0x2c] ss:$16 sps:$4 sm:$0xff]   ;;  %v1841_v39 = vld [vmem:[#allocation2 + $0x28] ss:$16 sps:$4 sm:$0xff]   ;;  %v1842_v40 = vld [vmem:[#allocation2 + $0x44] ss:$16 sps:$4 sm:$0xff]  }
  0x36   :  { %1572 = vmatpush3.bf16.msra.mxu0 %v1812_v14  ;;  %v1844_v41 = vld [vmem:[#allocation2 + $0x4c] ss:$16 sps:$4 sm:$0xff]   ;;  %v1846_v42 = vld [vmem:[#allocation2 + $0x40] ss:$16 sps:$4 sm:$0xff]   ;;  %v1847_v43 = vld [vmem:[#allocation2 + $0x48] ss:$16 sps:$4 sm:$0xff]  }
  0x37   :  { %1684 = vmatpush3.bf16.msra.mxu1 %v1813_v15  ;;  %1573 = vmatprep.subr.bf16.mxu0 %v1814_v16  ;;  %v1848_v44 = vld [vmem:[#allocation2 + $0x64] ss:$16 sps:$4 sm:$0xff]   ;;  %v1850_v45 = vld [vmem:[#allocation2 + $0x6c] ss:$16 sps:$4 sm:$0xff]   ;;  %v1852_v46 = vld [vmem:[#allocation2 + $0x60] ss:$16 sps:$4 sm:$0xff]  }
  0x38   :  { %1685 = vmatprep.subr.bf16.mxu1 %v1815_v17  ;;  %v1853_v47 = vld [vmem:[#allocation2 + $0x68] ss:$16 sps:$4 sm:$0xff]   ;;  %v1854_v48 = vld [vmem:[#allocation2 + $0x84] ss:$16 sps:$4 sm:$0xff]   ;;  %v1856_v49 = vld [vmem:[#allocation2 + $0x8c] ss:$16 sps:$4 sm:$0xff]  }
  0x39   :  { %v1858_v50 = vld [vmem:[#allocation2 + $0x80] ss:$16 sps:$4 sm:$0xff]   ;;  %v1859_v51 = vld [vmem:[#allocation2 + $0x88] ss:$16 sps:$4 sm:$0xff]   ;;  %v1860_v52 = vld [vmem:[#allocation2 + $0xa4] ss:$16 sps:$4 sm:$0xff]  }
  0x3a   :  { %1574 = vmatpush3.bf16.msra.mxu0 %v1816_v18  ;;  %v1862_v53 = vld [vmem:[#allocation2 + $0xac] ss:$16 sps:$4 sm:$0xff]   ;;  %v1864_v54 = vld [vmem:[#allocation2 + $0xa0] ss:$16 sps:$4 sm:$0xff]   ;;  %v1865_v55 = vld [vmem:[#allocation2 + $0xa8] ss:$16 sps:$4 sm:$0xff]  }
  0x3b   :  { %1686 = vmatpush3.bf16.msra.mxu1 %v1817_v19  ;;  %1575 = vmatprep.subr.bf16.mxu0 %v1818_v20  ;;  %v1866_v56 = vld [vmem:[#allocation2 + $0xc4] ss:$16 sps:$4 sm:$0xff]   ;;  %v1868_v57 = vld [vmem:[#allocation2 + $0xcc] ss:$16 sps:$4 sm:$0xff]   ;;  %v1870_v58 = vld [vmem:[#allocation2 + $0xc0] ss:$16 sps:$4 sm:$0xff]  }
  0x3c   :  { %1687 = vmatprep.subr.bf16.mxu1 %v1819_v21  ;;  %v1871_v59 = vld [vmem:[#allocation2 + $0xc8] ss:$16 sps:$4 sm:$0xff]   ;;  %v1872_v60 = vld [vmem:[#allocation2 + $0xe4] ss:$16 sps:$4 sm:$0xff]   ;;  %v1874_v61 = vld [vmem:[#allocation2 + $0xec] ss:$16 sps:$4 sm:$0xff]  }
  0x3d   :  { %v1876_v62 = vld [vmem:[#allocation2 + $0xe0] ss:$16 sps:$4 sm:$0xff]   ;;  %v1877_v63 = vld [vmem:[#allocation2 + $0xe8] ss:$16 sps:$4 sm:$0xff]   ;;  %v1878_v0 = vld [vmem:[#allocation2 + $0x104] ss:$16 sps:$4 sm:$0xff]  }
  0x3e   :  { %1576 = vmatpush3.bf16.msra.mxu0 %v1820_v22  ;;  %v1880_v1 = vld [vmem:[#allocation2 + $0x10c] ss:$16 sps:$4 sm:$0xff]   ;;  %v1882_v2 = vld [vmem:[#allocation2 + $0x100] ss:$16 sps:$4 sm:$0xff]   ;;  %v1883_v3 = vld [vmem:[#allocation2 + $0x108] ss:$16 sps:$4 sm:$0xff]  }
  0x3f   :  { %1688 = vmatpush3.bf16.msra.mxu1 %v1821_v23  ;;  %1577 = vmatprep.subr.bf16.mxu0 %v1822_v24  ;;  %v1884_v4 = vld [vmem:[#allocation2 + $0x124] ss:$16 sps:$4 sm:$0xff]   ;;  %v1886_v5 = vld [vmem:[#allocation2 + $0x12c] ss:$16 sps:$4 sm:$0xff]   ;;  %v1888_v6 = vld [vmem:[#allocation2 + $0x120] ss:$16 sps:$4 sm:$0xff]  }
  0x40   :  { %1689 = vmatprep.subr.bf16.mxu1 %v1823_v25  ;;  %v1889_v7 = vld [vmem:[#allocation2 + $0x128] ss:$16 sps:$4 sm:$0xff]   ;;  %v1890_v8 = vld [vmem:[#allocation2 + $0x144] ss:$16 sps:$4 sm:$0xff]   ;;  %v1892_v9 = vld [vmem:[#allocation2 + $0x14c] ss:$16 sps:$4 sm:$0xff]  }
  0x41   :  { %v1894_v10 = vld [vmem:[#allocation2 + $0x140] ss:$16 sps:$4 sm:$0xff]   ;;  %v1895_v11 = vld [vmem:[#allocation2 + $0x148] ss:$16 sps:$4 sm:$0xff]   ;;  %v1896_v12 = vld [vmem:[#allocation2 + $0x164] ss:$16 sps:$4 sm:$0xff]  }
  0x42   :  { %1578 = vmatpush3.bf16.msra.mxu0 %v1824_v26  ;;  %v1898_v13 = vld [vmem:[#allocation2 + $0x16c] ss:$16 sps:$4 sm:$0xff]   ;;  %v1900_v14 = vld [vmem:[#allocation2 + $0x160] ss:$16 sps:$4 sm:$0xff]   ;;  %v1901_v15 = vld [vmem:[#allocation2 + $0x168] ss:$16 sps:$4 sm:$0xff]  }
  0x43   :  { %1690 = vmatpush3.bf16.msra.mxu1 %v1825_v27  ;;  %1579 = vmatprep.subr.bf16.mxu0 %v1826_v28  ;;  %v1902_v16 = vld [vmem:[#allocation2 + $0x184] ss:$16 sps:$4 sm:$0xff]   ;;  %v1904_v17 = vld [vmem:[#allocation2 + $0x18c] ss:$16 sps:$4 sm:$0xff]   ;;  %v1906_v18 = vld [vmem:[#allocation2 + $0x180] ss:$16 sps:$4 sm:$0xff]  }
  0x44   :  { %1691 = vmatprep.subr.bf16.mxu1 %v1827_v29  ;;  %v1907_v19 = vld [vmem:[#allocation2 + $0x188] ss:$16 sps:$4 sm:$0xff]   ;;  %v1908_v20 = vld [vmem:[#allocation2 + $0x1a4] ss:$16 sps:$4 sm:$0xff]   ;;  %v1910_v21 = vld [vmem:[#allocation2 + $0x1ac] ss:$16 sps:$4 sm:$0xff]  }
  0x45   :  { %v1912_v22 = vld [vmem:[#allocation2 + $0x1a0] ss:$16 sps:$4 sm:$0xff]   ;;  %v1913_v23 = vld [vmem:[#allocation2 + $0x1a8] ss:$16 sps:$4 sm:$0xff]   ;;  %v1914_v24 = vld [vmem:[#allocation2 + $0x1c4] ss:$16 sps:$4 sm:$0xff]  }
  0x46   :  { %1580 = vmatpush3.bf16.msra.mxu0 %v1828_v30  ;;  %v1916_v25 = vld [vmem:[#allocation2 + $0x1cc] ss:$16 sps:$4 sm:$0xff]   ;;  %v1918_v26 = vld [vmem:[#allocation2 + $0x1c0] ss:$16 sps:$4 sm:$0xff]   ;;  %v1919_v27 = vld [vmem:[#allocation2 + $0x1c8] ss:$16 sps:$4 sm:$0xff]  }
  0x47   :  { %1692 = vmatpush3.bf16.msra.mxu1 %v1829_v31  ;;  %v1920_v28 = vld [vmem:[#allocation2 + $0x1e4] ss:$16 sps:$4 sm:$0xff]   ;;  %v1922_v29 = vld [vmem:[#allocation2 + $0x1ec] ss:$16 sps:$4 sm:$0xff]   ;;  %v1924_v30 = vld [vmem:[#allocation2 + $0x1e0] ss:$16 sps:$4 sm:$0xff]  }
  0x48   :  { %v1925_v31 = vld [vmem:[#allocation2 + $0x1e8] ss:$16 sps:$4 sm:$0xff]  }
  0x49   :  { %714 = vmatmul.mubr.bf16.vlgmr.msra.gmra.mrb[0].mxu0 %v1830_v32 }
  0x4a   :  { %875 = vmatmul.mubr.bf16.vlgmr.msra.gmra.mrb[0].mxu1 %v1833_v34  ;;  %721 = vmatprep.mubr.bf16.mxu0 %v1836_v36 }
  0x4b   :  { %882 = vmatprep.mubr.bf16.mxu1 %v1838_v37 }
  0x51   :  { %722 = vmatmul.mubr.bf16.gmra.mrb[4].mxu0 %v1840_v38 }
  0x52   :  { %883 = vmatmul.mubr.bf16.gmra.mrb[4].mxu1 %v1841_v39  ;;  %729 = vmatprep.mubr.bf16.mxu0 %v1842_v40 }
  0x53   :  { %890 = vmatprep.mubr.bf16.mxu1 %v1844_v41 }
  0x59   :  { %730 = vmatmul.mubr.bf16.gmra.mrb[8].mxu0 %v1846_v42 }
  0x5a   :  { %891 = vmatmul.mubr.bf16.gmra.mrb[8].mxu1 %v1847_v43  ;;  %737 = vmatprep.mubr.bf16.mxu0 %v1848_v44 }
  0x5b   :  { %898 = vmatprep.mubr.bf16.mxu1 %v1850_v45 }
  0x61   :  { %738 = vmatmul.mubr.bf16.gmra.mrb[12].mxu0 %v1852_v46 }
  0x62   :  { %899 = vmatmul.mubr.bf16.gmra.mrb[12].mxu1 %v1853_v47  ;;  %745 = vmatprep.mubr.bf16.mxu0 %v1854_v48 }
  0x63   :  { %906 = vmatprep.mubr.bf16.mxu1 %v1856_v49 }
  0x69   :  { %746 = vmatmul.mubr.bf16.gmra.mrb[16].mxu0 %v1858_v50 }
  0x6a   :  { %907 = vmatmul.mubr.bf16.gmra.mrb[16].mxu1 %v1859_v51  ;;  %753 = vmatprep.mubr.bf16.mxu0 %v1860_v52 }
  0x6b   :  { %914 = vmatprep.mubr.bf16.mxu1 %v1862_v53 }
  0x71   :  { %754 = vmatmul.mubr.bf16.gmra.mrb[20].mxu0 %v1864_v54 }
  0x72   :  { %915 = vmatmul.mubr.bf16.gmra.mrb[20].mxu1 %v1865_v55  ;;  %761 = vmatprep.mubr.bf16.mxu0 %v1866_v56 }
  0x73   :  { %922 = vmatprep.mubr.bf16.mxu1 %v1868_v57 }
  0x79   :  { %762 = vmatmul.mubr.bf16.gmra.mrb[24].mxu0 %v1870_v58 }
  0x7a   :  { %923 = vmatmul.mubr.bf16.gmra.mrb[24].mxu1 %v1871_v59  ;;  %769 = vmatprep.mubr.bf16.mxu0 %v1872_v60 }
  0x7b   :  { %930 = vmatprep.mubr.bf16.mxu1 %v1874_v61 }
  0x81   :  { %770 = vmatmul.mubr.bf16.gmra.mrb[28].mxu0 %v1876_v62 }
  0x82   :  { %931 = vmatmul.mubr.bf16.gmra.mrb[28].mxu1 %v1877_v63  ;;  %777 = vmatprep.mubr.bf16.mxu0 %v1878_v0 }
  0x83   :  { %938 = vmatprep.mubr.bf16.mxu1 %v1880_v1 }
  0x89   :  { %778 = vmatmul.mubr.bf16.gmra.mrb[32].mxu0 %v1882_v2 }
  0x8a   :  { %939 = vmatmul.mubr.bf16.gmra.mrb[32].mxu1 %v1883_v3  ;;  %785 = vmatprep.mubr.bf16.mxu0 %v1884_v4 }
  0x8b   :  { %946 = vmatprep.mubr.bf16.mxu1 %v1886_v5 }
  0x91   :  { %786 = vmatmul.mubr.bf16.gmra.mrb[36].mxu0 %v1888_v6 }
  0x92   :  { %947 = vmatmul.mubr.bf16.gmra.mrb[36].mxu1 %v1889_v7  ;;  %793 = vmatprep.mubr.bf16.mxu0 %v1890_v8 }
  0x93   :  { %954 = vmatprep.mubr.bf16.mxu1 %v1892_v9 }
  0x99   :  { %794 = vmatmul.mubr.bf16.gmra.mrb[40].mxu0 %v1894_v10 }
  0x9a   :  { %955 = vmatmul.mubr.bf16.gmra.mrb[40].mxu1 %v1895_v11  ;;  %801 = vmatprep.mubr.bf16.mxu0 %v1896_v12 }
  0x9b   :  { %962 = vmatprep.mubr.bf16.mxu1 %v1898_v13 }
  0xa1   :  { %802 = vmatmul.mubr.bf16.gmra.mrb[44].mxu0 %v1900_v14 }
  0xa2   :  { %963 = vmatmul.mubr.bf16.gmra.mrb[44].mxu1 %v1901_v15  ;;  %809 = vmatprep.mubr.bf16.mxu0 %v1902_v16 }
  0xa3   :  { %970 = vmatprep.mubr.bf16.mxu1 %v1904_v17 }
  0xa9   :  { %810 = vmatmul.mubr.bf16.gmra.mrb[48].mxu0 %v1906_v18 }
  0xaa   :  { %971 = vmatmul.mubr.bf16.gmra.mrb[48].mxu1 %v1907_v19  ;;  %817 = vmatprep.mubr.bf16.mxu0 %v1908_v20 }
  0xab   :  { %978 = vmatprep.mubr.bf16.mxu1 %v1910_v21 }
  0xb1   :  { %818 = vmatmul.mubr.bf16.gmra.mrb[52].mxu0 %v1912_v22 }
  0xb2   :  { %979 = vmatmul.mubr.bf16.gmra.mrb[52].mxu1 %v1913_v23  ;;  %825 = vmatprep.mubr.bf16.mxu0 %v1914_v24 }
  0xb3   :  { %986 = vmatprep.mubr.bf16.mxu1 %v1916_v25 }
  0xb9   :  { %826 = vmatmul.mubr.bf16.gmra.mrb[56].mxu0 %v1918_v26 }
  0xba   :  { %987 = vmatmul.mubr.bf16.gmra.mrb[56].mxu1 %v1919_v27  ;;  %833 = vmatprep.mubr.bf16.mxu0 %v1920_v28 }
  0xbb   :  { %994 = vmatprep.mubr.bf16.mxu1 %v1922_v29 }
  0xc1   :  { %834 = vmatmul.mubr.bf16.gmra.mrb[60].mxu0 %v1924_v30 }
  0xc2   :  { %995 = vmatmul.mubr.bf16.gmra.mrb[60].mxu1 %v1925_v31 }
 0x11c   :  { %v1581_v32 = vpop.f32.mrb[0].mxu0 }
 0x11d   :  { %v1693_v33 = vpop.f32.mrb[0].mxu1  ;;  %v1582_v34 = vpop.f32.mrb[1].mxu0 }
 0x11e   :  { %v1583_v35 = vadd.f32 %v1582_v34, %v1581_v32  ;;  %v1694_v36 = vpop.f32.mrb[1].mxu1  ;;  %v1584_v37 = vpop.f32.mrb[2].mxu0 }
 0x11f   :  { %v1695_v38 = vadd.f32 %v1694_v36, %v1693_v33  ;;  %v1696_v39 = vpop.f32.mrb[2].mxu1  ;;  %v1585_v40 = vpop.f32.mrb[3].mxu0 }
 0x120   :  { %v1586_v41 = vadd.f32 %v1585_v40, %v1584_v37  ;;  %v1697_v42 = vpop.f32.mrb[3].mxu1 }
 0x121   :  { %v1698_v43 = vadd.f32 %v1697_v42, %v1696_v39  ;;  %v877_v44 = vadd.f32 %v1695_v38, %v1583_v35 }
 0x123   :  { %v2112_v45 = vmul.f32 %v877_v44, %v877_v44  ;;  %v880_v46 = vadd.f32 %v1698_v43, %v1586_v41 }
 0x124   :  { %v1587_v47 = vpop.f32.mrb[4].mxu0 }
 0x125   :  { %v1699_v48 = vpop.f32.mrb[4].mxu1  ;;  %1035 = vrot.lane.b32.xlu0 %v2112_v45, %s2066_s0  ;;  %v1588_v49 = vpop.f32.mrb[5].mxu0  ;;  %v2116_v56 = vmul.f32 %v880_v46, %v880_v46 }
 0x126   :  { %v1589_v50 = vadd.f32 %v1588_v49, %v1587_v47  ;;  %v1700_v51 = vpop.f32.mrb[5].mxu1  ;;  %v1590_v52 = vpop.f32.mrb[6].mxu0 }
 0x127   :  { %v1701_v53 = vadd.f32 %v1700_v51, %v1699_v48  ;;  %v1702_v54 = vpop.f32.mrb[6].mxu1  ;;  %v1591_v55 = vpop.f32.mrb[7].mxu0 }
 0x128   :  { %v1592_v57 = vadd.f32 %v1591_v55, %v1590_v52  ;;  %v1703_v58 = vpop.f32.mrb[7].mxu1 }
 0x129   :  { %v1704_v59 = vadd.f32 %v1703_v58, %v1702_v54  ;;  %1037 = vrot.lane.b32.xlu0 %v2116_v56, %s2066_s0  ;;  %v885_v60 = vadd.f32 %v1701_v53, %v1589_v50 }
 0x12b   :  { %v2120_v61 = vmul.f32 %v885_v60, %v885_v60  ;;  %v888_v62 = vadd.f32 %v1704_v59, %v1592_v57 }
 0x12c   :  { %v1593_v63 = vpop.f32.mrb[8].mxu0 }
 0x12d   :  { %v1705_v0 = vpop.f32.mrb[8].mxu1  ;;  %1039 = vrot.lane.b32.xlu1 %v2120_v61, %s2066_s0  ;;  %v1594_v1 = vpop.f32.mrb[9].mxu0  ;;  %v2124_v8 = vmul.f32 %v888_v62, %v888_v62 }
 0x12e   :  { %v1595_v2 = vadd.f32 %v1594_v1, %v1593_v63  ;;  %v1706_v3 = vpop.f32.mrb[9].mxu1  ;;  %v1596_v4 = vpop.f32.mrb[10].mxu0 }
 0x12f   :  { %v1707_v5 = vadd.f32 %v1706_v3, %v1705_v0  ;;  %v1708_v6 = vpop.f32.mrb[10].mxu1  ;;  %v1597_v7 = vpop.f32.mrb[11].mxu0 }
 0x130   :  { %v1598_v9 = vadd.f32 %v1597_v7, %v1596_v4  ;;  %v1709_v10 = vpop.f32.mrb[11].mxu1 }
 0x131   :  { %v1710_v11 = vadd.f32 %v1709_v10, %v1708_v6  ;;  %1041 = vrot.lane.b32.xlu1 %v2124_v8, %s2066_s0  ;;  %v893_v12 = vadd.f32 %v1707_v5, %v1595_v2 }
 0x133   :  { %v2128_v13 = vmul.f32 %v893_v12, %v893_v12  ;;  %v896_v14 = vadd.f32 %v1710_v11, %v1598_v9 }
 0x134   :  { %v1599_v15 = vpop.f32.mrb[12].mxu0 }
 0x135   :  { %v1711_v16 = vpop.f32.mrb[12].mxu1  ;;  %1043 = vrot.lane.b32.xlu0 %v2128_v13, %s2066_s0  ;;  %v1600_v17 = vpop.f32.mrb[13].mxu0  ;;  %v2132_v18 = vmul.f32 %v896_v14, %v896_v14 }
 0x136   :  { %v1601_v19 = vadd.f32 %v1600_v17, %v1599_v15  ;;  %v1712_v20 = vpop.f32.mrb[13].mxu1  ;;  %v1602_v21 = vpop.f32.mrb[14].mxu0 }
 0x137   :  { %v1713_v22 = vadd.f32 %v1712_v20, %v1711_v16  ;;  %v1714_v23 = vpop.f32.mrb[14].mxu1  ;;  %1045 = vrot.lane.b32.xlu1 %v2132_v18, %s2066_s0  ;;  %v1603_v24 = vpop.f32.mrb[15].mxu0 }
 0x138   :  { %v1604_v25 = vadd.f32 %v1603_v24, %v1602_v21  ;;  %v1715_v26 = vpop.f32.mrb[15].mxu1 }
 0x139   :  { %v1716_v27 = vadd.f32 %v1715_v26, %v1714_v23  ;;  %v901_v28 = vadd.f32 %v1713_v22, %v1601_v19 }
 0x13b   :  { %v2136_v29 = vmul.f32 %v901_v28, %v901_v28  ;;  %v904_v30 = vadd.f32 %v1716_v27, %v1604_v25 }
 0x13c   :  { %v1605_v31 = vpop.f32.mrb[16].mxu0 }
 0x13d   :  { %v1717_v32 = vpop.f32.mrb[16].mxu1  ;;  %1047 = vrot.lane.b32.xlu0 %v2136_v29, %s2066_s0  ;;  %v1606_v33 = vpop.f32.mrb[17].mxu0  ;;  %v2140_v34 = vmul.f32 %v904_v30, %v904_v30 }
 0x13e   :  { %v1607_v35 = vadd.f32 %v1606_v33, %v1605_v31  ;;  %v1718_v36 = vpop.f32.mrb[17].mxu1  ;;  %v1608_v37 = vpop.f32.mrb[18].mxu0 }
 0x13f   :  { %v1719_v38 = vadd.f32 %v1718_v36, %v1717_v32  ;;  %v1720_v39 = vpop.f32.mrb[18].mxu1  ;;  %1049 = vrot.lane.b32.xlu1 %v2140_v34, %s2066_s0  ;;  %v1609_v40 = vpop.f32.mrb[19].mxu0 }
 0x140   :  { %v1610_v41 = vadd.f32 %v1609_v40, %v1608_v37  ;;  %v1721_v42 = vpop.f32.mrb[19].mxu1 }
 0x141   :  { %v1722_v43 = vadd.f32 %v1721_v42, %v1720_v39  ;;  %v909_v44 = vadd.f32 %v1719_v38, %v1607_v35 }
 0x143   :  { %v2144_v46 = vmul.f32 %v909_v44, %v909_v44  ;;  %v912_v47 = vadd.f32 %v1722_v43, %v1610_v41 }
 0x144   :  { %v1611_v48 = vpop.f32.mrb[20].mxu0 }
 0x145   :  { %v1723_v49 = vpop.f32.mrb[20].mxu1  ;;  %1051 = vrot.lane.b32.xlu0 %v2144_v46, %s2066_s0  ;;  %v1612_v50 = vpop.f32.mrb[21].mxu0  ;;  %v2148_v51 = vmul.f32 %v912_v47, %v912_v47 }
 0x146   :  { %v1613_v52 = vadd.f32 %v1612_v50, %v1611_v48  ;;  %v1724_v53 = vpop.f32.mrb[21].mxu1  ;;  %v1614_v54 = vpop.f32.mrb[22].mxu0 }
 0x147   :  { %v1725_v55 = vadd.f32 %v1724_v53, %v1723_v49  ;;  %v1726_v57 = vpop.f32.mrb[22].mxu1  ;;  %1053 = vrot.lane.b32.xlu1 %v2148_v51, %s2066_s0  ;;  %v1615_v58 = vpop.f32.mrb[23].mxu0 }
 0x148   :  { %v1616_v59 = vadd.f32 %v1615_v58, %v1614_v54  ;;  %v1727_v60 = vpop.f32.mrb[23].mxu1 }
 0x149   :  { %v1728_v62 = vadd.f32 %v1727_v60, %v1726_v57  ;;  %v917_v63 = vadd.f32 %v1725_v55, %v1613_v52 }
 0x14b   :  { %v2152_v0 = vmul.f32 %v917_v63, %v917_v63  ;;  %v920_v1 = vadd.f32 %v1728_v62, %v1616_v59 }
 0x14c   :  { %v1617_v2 = vpop.f32.mrb[24].mxu0 }
 0x14d   :  { %v1729_v3 = vpop.f32.mrb[24].mxu1  ;;  %1055 = vrot.lane.b32.xlu0 %v2152_v0, %s2066_s0  ;;  %v1618_v4 = vpop.f32.mrb[25].mxu0  ;;  %v2156_v5 = vmul.f32 %v920_v1, %v920_v1 }
 0x14e   :  { %v1619_v6 = vadd.f32 %v1618_v4, %v1617_v2  ;;  %v1730_v7 = vpop.f32.mrb[25].mxu1  ;;  %v1620_v9 = vpop.f32.mrb[26].mxu0 }
 0x14f   :  { %v1731_v10 = vadd.f32 %v1730_v7, %v1729_v3  ;;  %v1732_v11 = vpop.f32.mrb[26].mxu1  ;;  %1057 = vrot.lane.b32.xlu1 %v2156_v5, %s2066_s0  ;;  %v1621_v12 = vpop.f32.mrb[27].mxu0 }
 0x150   :  { %v1622_v14 = vadd.f32 %v1621_v12, %v1620_v9  ;;  %v1733_v15 = vpop.f32.mrb[27].mxu1 }
 0x151   :  { %v1734_v16 = vadd.f32 %v1733_v15, %v1732_v11  ;;  %v925_v17 = vadd.f32 %v1731_v10, %v1619_v6 }
 0x153   :  { %v2160_v19 = vmul.f32 %v925_v17, %v925_v17  ;;  %v928_v20 = vadd.f32 %v1734_v16, %v1622_v14 }
 0x154   :  { %v1623_v21 = vpop.f32.mrb[28].mxu0 }
 0x155   :  { %v1735_v22 = vpop.f32.mrb[28].mxu1  ;;  %1059 = vrot.lane.b32.xlu0 %v2160_v19, %s2066_s0  ;;  %v1624_v23 = vpop.f32.mrb[29].mxu0  ;;  %v2164_v24 = vmul.f32 %v928_v20, %v928_v20 }
 0x156   :  { %v1625_v25 = vadd.f32 %v1624_v23, %v1623_v21  ;;  %v1736_v26 = vpop.f32.mrb[29].mxu1  ;;  %v1626_v27 = vpop.f32.mrb[30].mxu0 }
 0x157   :  { %v1737_v28 = vadd.f32 %v1736_v26, %v1735_v22  ;;  %v1738_v30 = vpop.f32.mrb[30].mxu1  ;;  %1061 = vrot.lane.b32.xlu1 %v2164_v24, %s2066_s0  ;;  %v1627_v31 = vpop.f32.mrb[31].mxu0 }
 0x158   :  { %v1628_v32 = vadd.f32 %v1627_v31, %v1626_v27  ;;  %v1739_v33 = vpop.f32.mrb[31].mxu1 }
 0x159   :  { %v1740_v35 = vadd.f32 %v1739_v33, %v1738_v30  ;;  %v933_v36 = vadd.f32 %v1737_v28, %v1625_v25 }
 0x15b   :  { %v2168_v37 = vmul.f32 %v933_v36, %v933_v36  ;;  %v936_v38 = vadd.f32 %v1740_v35, %v1628_v32 }
 0x15c   :  { %v1629_v39 = vpop.f32.mrb[32].mxu0 }
 0x15d   :  { %v1741_v40 = vpop.f32.mrb[32].mxu1  ;;  %1063 = vrot.lane.b32.xlu0 %v2168_v37, %s2066_s0  ;;  %v1630_v41 = vpop.f32.mrb[33].mxu0  ;;  %v2172_v42 = vmul.f32 %v936_v38, %v936_v38 }
 0x15e   :  { %v1631_v43 = vadd.f32 %v1630_v41, %v1629_v39  ;;  %v1742_v44 = vpop.f32.mrb[33].mxu1  ;;  %v1632_v47 = vpop.f32.mrb[34].mxu0 }
 0x15f   :  { %v1743_v48 = vadd.f32 %v1742_v44, %v1741_v40  ;;  %v1744_v49 = vpop.f32.mrb[34].mxu1  ;;  %1065 = vrot.lane.b32.xlu1 %v2172_v42, %s2066_s0  ;;  %v1633_v50 = vpop.f32.mrb[35].mxu0 }
 0x160   :  { %v1634_v52 = vadd.f32 %v1633_v50, %v1632_v47  ;;  %v1745_v53 = vpop.f32.mrb[35].mxu1 }
 0x161   :  { %v1746_v54 = vadd.f32 %v1745_v53, %v1744_v49  ;;  %v941_v55 = vadd.f32 %v1743_v48, %v1631_v43 }
 0x163   :  { %v2176_v57 = vmul.f32 %v941_v55, %v941_v55  ;;  %v944_v58 = vadd.f32 %v1746_v54, %v1634_v52 }
 0x164   :  { %v1635_v59 = vpop.f32.mrb[36].mxu0 }
 0x165   :  { %v1747_v60 = vpop.f32.mrb[36].mxu1  ;;  %1067 = vrot.lane.b32.xlu0 %v2176_v57, %s2066_s0  ;;  %v1636_v62 = vpop.f32.mrb[37].mxu0  ;;  %v2180_v63 = vmul.f32 %v944_v58, %v944_v58 }
 0x166   :  { %v1637_v1 = vadd.f32 %v1636_v62, %v1635_v59  ;;  %v1748_v2 = vpop.f32.mrb[37].mxu1  ;;  %v1638_v3 = vpop.f32.mrb[38].mxu0 }
 0x167   :  { %v1749_v4 = vadd.f32 %v1748_v2, %v1747_v60  ;;  %v1750_v6 = vpop.f32.mrb[38].mxu1  ;;  %1069 = vrot.lane.b32.xlu1 %v2180_v63, %s2066_s0  ;;  %v1639_v7 = vpop.f32.mrb[39].mxu0 }
 0x168   :  { %v1640_v9 = vadd.f32 %v1639_v7, %v1638_v3  ;;  %v1751_v10 = vpop.f32.mrb[39].mxu1 }
 0x169   :  { %v1752_v11 = vadd.f32 %v1751_v10, %v1750_v6  ;;  %v949_v12 = vadd.f32 %v1749_v4, %v1637_v1 }
 0x16b   :  { %v2184_v14 = vmul.f32 %v949_v12, %v949_v12  ;;  %v952_v15 = vadd.f32 %v1752_v11, %v1640_v9 }
 0x16c   :  { %v1641_v16 = vpop.f32.mrb[40].mxu0 }
 0x16d   :  { %v1753_v17 = vpop.f32.mrb[40].mxu1  ;;  %1071 = vrot.lane.b32.xlu0 %v2184_v14, %s2066_s0  ;;  %v1642_v20 = vpop.f32.mrb[41].mxu0  ;;  %v2188_v21 = vmul.f32 %v952_v15, %v952_v15 }
 0x16e   :  { %v1643_v22 = vadd.f32 %v1642_v20, %v1641_v16  ;;  %v1754_v23 = vpop.f32.mrb[41].mxu1  ;;  %v1644_v25 = vpop.f32.mrb[42].mxu0 }
 0x16f   :  { %v1755_v26 = vadd.f32 %v1754_v23, %v1753_v17  ;;  %v1756_v27 = vpop.f32.mrb[42].mxu1  ;;  %1073 = vrot.lane.b32.xlu1 %v2188_v21, %s2066_s0  ;;  %v1645_v28 = vpop.f32.mrb[43].mxu0 }
 0x170   :  { %v1646_v30 = vadd.f32 %v1645_v28, %v1644_v25  ;;  %v1757_v31 = vpop.f32.mrb[43].mxu1 }
 0x171   :  { %v1758_v32 = vadd.f32 %v1757_v31, %v1756_v27  ;;  %v957_v33 = vadd.f32 %v1755_v26, %v1643_v22 }
 0x173   :  { %v2192_v35 = vmul.f32 %v957_v33, %v957_v33  ;;  %v960_v36 = vadd.f32 %v1758_v32, %v1646_v30 }
 0x174   :  { %v1647_v38 = vpop.f32.mrb[44].mxu0 }
 0x175   :  { %v1759_v39 = vpop.f32.mrb[44].mxu1  ;;  %1075 = vrot.lane.b32.xlu0 %v2192_v35, %s2066_s0  ;;  %v1648_v40 = vpop.f32.mrb[45].mxu0  ;;  %v2196_v41 = vmul.f32 %v960_v36, %v960_v36 }
 0x176   :  { %v1649_v43 = vadd.f32 %v1648_v40, %v1647_v38  ;;  %v1760_v44 = vpop.f32.mrb[45].mxu1  ;;  %v1650_v47 = vpop.f32.mrb[46].mxu0 }
 0x177   :  { %v1761_v48 = vadd.f32 %v1760_v44, %v1759_v39  ;;  %v1762_v49 = vpop.f32.mrb[46].mxu1  ;;  %1077 = vrot.lane.b32.xlu1 %v2196_v41, %s2066_s0  ;;  %v1651_v50 = vpop.f32.mrb[47].mxu0 }
 0x178   :  { %v1652_v52 = vadd.f32 %v1651_v50, %v1650_v47  ;;  %v1763_v53 = vpop.f32.mrb[47].mxu1 }
 0x179   :  { %v1764_v54 = vadd.f32 %v1763_v53, %v1762_v49  ;;  %v965_v55 = vadd.f32 %v1761_v48, %v1649_v43 }
 0x17b   :  { %v2200_v58 = vmul.f32 %v965_v55, %v965_v55  ;;  %v968_v59 = vadd.f32 %v1764_v54, %v1652_v52 }
 0x17c   :  { %v1653_v60 = vpop.f32.mrb[48].mxu0 }
 0x17d   :  { %v1765_v62 = vpop.f32.mrb[48].mxu1  ;;  %1079 = vrot.lane.b32.xlu0 %v2200_v58, %s2066_s0  ;;  %v1654_v1 = vpop.f32.mrb[49].mxu0  ;;  %v2204_v2 = vmul.f32 %v968_v59, %v968_v59 }
 0x17e   :  { %v1655_v3 = vadd.f32 %v1654_v1, %v1653_v60  ;;  %v1766_v4 = vpop.f32.mrb[49].mxu1  ;;  %v1656_v6 = vpop.f32.mrb[50].mxu0 }
 0x17f   :  { %v1767_v7 = vadd.f32 %v1766_v4, %v1765_v62  ;;  %v1768_v9 = vpop.f32.mrb[50].mxu1  ;;  %1081 = vrot.lane.b32.xlu1 %v2204_v2, %s2066_s0  ;;  %v1657_v10 = vpop.f32.mrb[51].mxu0 }
 0x180   :  { %v1658_v11 = vadd.f32 %v1657_v10, %v1656_v6  ;;  %v1769_v12 = vpop.f32.mrb[51].mxu1 }
 0x181   :  { %v1770_v15 = vadd.f32 %v1769_v12, %v1768_v9  ;;  %v973_v16 = vadd.f32 %v1767_v7, %v1655_v3 }
 0x183   :  { %v2208_v17 = vmul.f32 %v973_v16, %v973_v16  ;;  %v976_v20 = vadd.f32 %v1770_v15, %v1658_v11 }
 0x184   :  { %v1659_v22 = vpop.f32.mrb[52].mxu0 }
 0x185   :  { %v1771_v23 = vpop.f32.mrb[52].mxu1  ;;  %1083 = vrot.lane.b32.xlu0 %v2208_v17, %s2066_s0  ;;  %v1660_v25 = vpop.f32.mrb[53].mxu0  ;;  %v2212_v26 = vmul.f32 %v976_v20, %v976_v20 }
 0x186   :  { %v1661_v27 = vadd.f32 %v1660_v25, %v1659_v22  ;;  %v1772_v28 = vpop.f32.mrb[53].mxu1  ;;  %v1662_v30 = vpop.f32.mrb[54].mxu0 }
 0x187   :  { %v1773_v31 = vadd.f32 %v1772_v28, %v1771_v23  ;;  %v1774_v32 = vpop.f32.mrb[54].mxu1  ;;  %1085 = vrot.lane.b32.xlu1 %v2212_v26, %s2066_s0  ;;  %v1663_v33 = vpop.f32.mrb[55].mxu0 }
 0x188   :  { %v1664_v36 = vadd.f32 %v1663_v33, %v1662_v30  ;;  %v1775_v38 = vpop.f32.mrb[55].mxu1 }
 0x189   :  { %v1776_v39 = vadd.f32 %v1775_v38, %v1774_v32  ;;  %v981_v40 = vadd.f32 %v1773_v31, %v1661_v27 }
 0x18b   :  { %v2216_v43 = vmul.f32 %v981_v40, %v981_v40  ;;  %v984_v44 = vadd.f32 %v1776_v39, %v1664_v36 }
 0x18c   :  { %v1665_v47 = vpop.f32.mrb[56].mxu0 }
 0x18d   :  { %v1777_v48 = vpop.f32.mrb[56].mxu1  ;;  %1087 = vrot.lane.b32.xlu0 %v2216_v43, %s2066_s0  ;;  %v1666_v49 = vpop.f32.mrb[57].mxu0  ;;  %v2220_v50 = vmul.f32 %v984_v44, %v984_v44 }
 0x18e   :  { %v1667_v52 = vadd.f32 %v1666_v49, %v1665_v47  ;;  %v1778_v53 = vpop.f32.mrb[57].mxu1  ;;  %v1668_v54 = vpop.f32.mrb[58].mxu0 }
 0x18f   :  { %v1779_v55 = vadd.f32 %v1778_v53, %v1777_v48  ;;  %v1780_v59 = vpop.f32.mrb[58].mxu1  ;;  %1089 = vrot.lane.b32.xlu1 %v2220_v50, %s2066_s0  ;;  %v1669_v60 = vpop.f32.mrb[59].mxu0 }
 0x190   :  { %v1670_v62 = vadd.f32 %v1669_v60, %v1668_v54  ;;  %v1781_v1 = vpop.f32.mrb[59].mxu1 }
 0x191   :  { %v1782_v3 = vadd.f32 %v1781_v1, %v1780_v59  ;;  %v989_v4 = vadd.f32 %v1779_v55, %v1667_v52 }
 0x193   :  { %v2224_v6 = vmul.f32 %v989_v4, %v989_v4  ;;  %v992_v7 = vadd.f32 %v1782_v3, %v1670_v62 }
 0x194   :  { %v1671_v9 = vpop.f32.mrb[60].mxu0 }
 0x195   :  { %v1783_v10 = vpop.f32.mrb[60].mxu1  ;;  %1091 = vrot.lane.b32.xlu0 %v2224_v6, %s2066_s0  ;;  %v1672_v11 = vpop.f32.mrb[61].mxu0  ;;  %v2228_v12 = vmul.f32 %v992_v7, %v992_v7 }
 0x196   :  { %v1673_v15 = vadd.f32 %v1672_v11, %v1671_v9  ;;  %v1784_v16 = vpop.f32.mrb[61].mxu1  ;;  %v1674_v20 = vpop.f32.mrb[62].mxu0 }
 0x197   :  { %v1785_v22 = vadd.f32 %v1784_v16, %v1783_v10  ;;  %v1786_v23 = vpop.f32.mrb[62].mxu1  ;;  %1093 = vrot.lane.b32.xlu1 %v2228_v12, %s2066_s0  ;;  %v1036_v25 = vpop.permute.xlu0 %1035 }
 0x198   :  { %v1099_v27 = vadd.f32 %v1036_v25, %v2112_v45  ;;  %v1675_v28 = vpop.f32.mrb[63].mxu0  ;;  %v1787_v30 = vpop.f32.mrb[63].mxu1 }
 0x199   :  { %v1676_v31 = vadd.f32 %v1675_v28, %v1674_v20  ;;  %v1788_v32 = vadd.f32 %v1787_v30, %v1786_v23  ;;  %v997_v33 = vadd.f32 %v1785_v22, %v1673_v15 }
 0x19a   :  { %1926 = vrsqrt.f32 %v1099_v27  ;;  %vm1133_vm0 = vcmp.eq.f32.partialorder %v1099_v27, inf  ;;  %vm1135_vm1 = vcmp.eq.f32.partialorder %v1099_v27, 0.0 }
 0x19b   :  { %v1038_v36 = vpop.permute.xlu0 %1037  ;;  %v2233_v38 = vmul.f32 %v997_v33, %v997_v33  ;;  %v1000_v39 = vadd.f32 %v1788_v32, %v1676_v31 }
 0x19c   :  { %v1100_v40 = vadd.f32 %v1038_v36, %v2116_v56  ;;  %v1136_v56 = vand.u32 2147483648, %v1099_v27 }
 0x19d   :  { %1095 = vrot.lane.b32.xlu0 %v2233_v38, %s2066_s0  ;;  %v2238_v44 = vmul.f32 %v1000_v39, %v1000_v39 }
 0x19e   :  { %1928 = vrsqrt.f32 %v1100_v40  ;;  %vm1140_vm2 = vcmp.eq.f32.partialorder %v1100_v40, inf  ;;  %vm1142_vm3 = vcmp.eq.f32.partialorder %v1100_v40, 0.0 }
 0x19f   :  { %1097 = vrot.lane.b32.xlu1 %v2238_v44, %s2066_s0  ;;  %v1040_v45 = vpop.permute.xlu1 %1039 }
 0x1a0   :  { %v1101_v47 = vadd.f32 %v1040_v45, %v2120_v61  ;;  %v1143_v61 = vand.u32 2147483648, %v1100_v40 }
 0x1a2   :  { %1930 = vrsqrt.f32 %v1101_v47  ;;  %vm1147_vm4 = vcmp.eq.f32.partialorder %v1101_v47, inf  ;;  %v1150_v20 = vand.u32 2147483648, %v1101_v47  ;;  %vm1149_vm5 = vcmp.eq.f32.partialorder %v1101_v47, 0.0 }
 0x1a3   :  { %v1042_v48 = vpop.permute.xlu1 %1041 }
 0x1a4   :  { %v1927_v49 = vpop.eup %1926  ;;  %v1102_v52 = vadd.f32 %v1042_v48, %v2124_v8 }
 0x1a5   :  { %v1132_v53 = vmul.f32 %v1927_v49, %v1099_v27 }
 0x1a6   :  { %1932 = vrsqrt.f32 %v1102_v52  ;;  %vm1154_vm6 = vcmp.eq.f32.partialorder %v1102_v52, inf  ;;  %v1157_v32 = vand.u32 2147483648, %v1102_v52  ;;  %vm1156_vm7 = vcmp.eq.f32.partialorder %v1102_v52, 0.0 }
 0x1a7   :  { %v1134_v54 = vsel %vm1133_vm0, %v1099_v27, %v1132_v53  ;;  %v1044_v55 = vpop.permute.xlu0 %1043 }
 0x1a8   :  { %v1929_v59 = vpop.eup %1928  ;;  %v1137_v60 = vsel %vm1135_vm1, %v1136_v56, %v1134_v54  ;;  %v1103_v62 = vadd.f32 %v1044_v55, %v2128_v13 }
 0x1a9   :  { %v1355_v1 = vmax.f32 %v1137_v60, 0.0  ;;  %v1139_v3 = vmul.f32 %v1929_v59, %v1100_v40  ;;  %v1046_v4 = vpop.permute.xlu1 %1045 }
 0x1aa   :  { %1934 = vrsqrt.f32 %v1103_v62  ;;  %v1104_v8 = vadd.f32 %v1046_v4, %v2132_v18  ;;  %vm1161_vm8 = vcmp.eq.f32.partialorder %v1103_v62, inf  ;;  %vm1163_vm9 = vcmp.eq.f32.partialorder %v1103_v62, 0.0 }
 0x1ab   :  { %v1387_v7 = vmin.f32 %v1355_v1, 10.0  ;;  %v1141_v9 = vsel %vm1140_vm2, %v1100_v40, %v1139_v3 }
 0x1ac   :  { %v1931_v10 = vpop.eup %1930  ;;  %v1144_v11 = vsel %vm1142_vm3, %v1143_v61, %v1141_v9  ;;  %1936 = vrsqrt.f32 %v1104_v8  ;;  %vm1168_vm10 = vcmp.eq.f32.partialorder %v1104_v8, inf  ;;  %vm1170_vm11 = vcmp.eq.f32.partialorder %v1104_v8, 0.0 }
 0x1ad   :  { %1419 = vst [vmem:[#allocation7] sm:$0xff] %v1387_v7  ;;  %v1356_v15 = vmax.f32 %v1144_v11, 0.0  ;;  %v1146_v16 = vmul.f32 %v1931_v10, %v1101_v47 }
 0x1af   :  { %v1388_v13 = vmin.f32 %v1356_v15, 10.0  ;;  %v1148_v22 = vsel %vm1147_vm4, %v1101_v47, %v1146_v16  ;;  %v1048_v23 = vpop.permute.xlu0 %1047 }
 0x1b0   :  { %v1933_v25 = vpop.eup %1932  ;;  %v1151_v27 = vsel %vm1149_vm5, %v1150_v20, %v1148_v22  ;;  %v1105_v28 = vadd.f32 %v1048_v23, %v2136_v29  ;;  %v1164_v29 = vand.u32 2147483648, %v1103_v62 }
 0x1b1   :  { %1420 = vst [vmem:[#allocation7 + $0x8] sm:$0xff] %v1388_v13  ;;  %v1357_v30 = vmax.f32 %v1151_v27, 0.0  ;;  %v1153_v31 = vmul.f32 %v1933_v25, %v1102_v52  ;;  %v1050_v18 = vpop.permute.xlu1 %1049 }
 0x1b2   :  { %1938 = vrsqrt.f32 %v1105_v28  ;;  %v1106_v39 = vadd.f32 %v1050_v18, %v2140_v34  ;;  %v1171_v34 = vand.u32 2147483648, %v1104_v8  ;;  %vm1175_vm12 = vcmp.eq.f32.partialorder %v1105_v28, inf }
 0x1b3   :  { %v1389_v33 = vmin.f32 %v1357_v30, 10.0  ;;  %v1155_v36 = vsel %vm1154_vm6, %v1102_v52, %v1153_v31  ;;  %vm1177_vm13 = vcmp.eq.f32.partialorder %v1105_v28, 0.0 }
 0x1b4   :  { %v1935_v40 = vpop.eup %1934  ;;  %v1158_v45 = vsel %vm1156_vm7, %v1157_v32, %v1155_v36  ;;  %1940 = vrsqrt.f32 %v1106_v39  ;;  %vm1182_vm14 = vcmp.eq.f32.partialorder %v1106_v39, inf  ;;  %vm1184_vm15 = vcmp.eq.f32.partialorder %v1106_v39, 0.0 }
 0x1b5   :  { %1421 = vst [vmem:[#allocation7 + $0x10] sm:$0xff] %v1389_v33  ;;  %v1358_v47 = vmax.f32 %v1158_v45, 0.0  ;;  %v1160_v48 = vmul.f32 %v1935_v40, %v1103_v62 }
 0x1b6   :  { %v1937_v49 = vpop.eup %1936 }
 0x1b7   :  { %v1390_v53 = vmin.f32 %v1358_v47, 10.0  ;;  %v1162_v56 = vsel %vm1161_vm8, %v1103_v62, %v1160_v48  ;;  %v1052_v54 = vpop.permute.xlu0 %1051  ;;  %v1167_v59 = vmul.f32 %v1937_v49, %v1104_v8 }
 0x1b8   :  { %v1165_v55 = vsel %vm1163_vm9, %v1164_v29, %v1162_v56  ;;  %v1107_v60 = vadd.f32 %v1052_v54, %v2144_v46  ;;  %v1178_v46 = vand.u32 2147483648, %v1105_v28 }
 0x1b9   :  { %1422 = vst [vmem:[#allocation7 + $0x18] sm:$0xff] %v1390_v53  ;;  %v1359_v52 = vmax.f32 %v1165_v55, 0.0  ;;  %v1054_v1 = vpop.permute.xlu1 %1053  ;;  %v1169_v3 = vsel %vm1168_vm10, %v1104_v8, %v1167_v59 }
 0x1ba   :  { %1942 = vrsqrt.f32 %v1107_v60  ;;  %v1172_v61 = vsel %vm1170_vm11, %v1171_v34, %v1169_v3  ;;  %v1108_v7 = vadd.f32 %v1054_v1, %v2148_v51  ;;  %v1185_v51 = vand.u32 2147483648, %v1106_v39 }
 0x1bb   :  { %v1391_v4 = vmin.f32 %v1359_v52, 10.0  ;;  %v1360_v10 = vmax.f32 %v1172_v61, 0.0  ;;  %vm1189_vm0 = vcmp.eq.f32.partialorder %v1107_v60, inf  ;;  %v1192_v40 = vand.u32 2147483648, %v1107_v60 }
 0x1bc   :  { %v1939_v9 = vpop.eup %1938  ;;  %1944 = vrsqrt.f32 %v1108_v7  ;;  %vm1191_vm1 = vcmp.eq.f32.partialorder %v1107_v60, 0.0  ;;  %vm1196_vm2 = vcmp.eq.f32.partialorder %v1108_v7, inf  ;;  %vm1198_vm3 = vcmp.eq.f32.partialorder %v1108_v7, 0.0 }
 0x1bd   :  { %1423 = vst [vmem:[#allocation7 + $0x20] sm:$0xff] %v1391_v4  ;;  %v1174_v62 = vmul.f32 %v1939_v9, %v1105_v28  ;;  %v1392_v11 = vmin.f32 %v1360_v10, 10.0 }
 0x1be   :  { %v1941_v15 = vpop.eup %1940 }
 0x1bf   :  { %v1176_v16 = vsel %vm1175_vm12, %v1105_v28, %v1174_v62  ;;  %v1056_v20 = vpop.permute.xlu0 %1055  ;;  %1424 = vst [vmem:[#allocation7 + $0x28] sm:$0xff] %v1392_v11  ;;  %v1181_v8 = vmul.f32 %v1941_v15, %v1106_v39 }
 0x1c0   :  { %v1179_v13 = vsel %vm1177_vm13, %v1178_v46, %v1176_v16  ;;  %v1109_v22 = vadd.f32 %v1056_v20, %v2152_v0 }
 0x1c1   :  { %v1361_v23 = vmax.f32 %v1179_v13, 0.0  ;;  %v1058_v25 = vpop.permute.xlu1 %1057  ;;  %v1183_v27 = vsel %vm1182_vm14, %v1106_v39, %v1181_v8 }
 0x1c2   :  { %1946 = vrsqrt.f32 %v1109_v22  ;;  %v1186_v31 = vsel %vm1184_vm15, %v1185_v51, %v1183_v27  ;;  %v1110_v18 = vadd.f32 %v1058_v25, %v2156_v5  ;;  %v1199_v5 = vand.u32 2147483648, %v1108_v7 }
 0x1c3   :  { %v1393_v30 = vmin.f32 %v1361_v23, 10.0  ;;  %v1362_v33 = vmax.f32 %v1186_v31, 0.0  ;;  %vm1203_vm4 = vcmp.eq.f32.partialorder %v1109_v22, inf  ;;  %v1206_v3 = vand.u32 2147483648, %v1109_v22 }
 0x1c4   :  { %v1943_v32 = vpop.eup %1942  ;;  %1948 = vrsqrt.f32 %v1110_v18  ;;  %vm1205_vm5 = vcmp.eq.f32.partialorder %v1109_v22, 0.0  ;;  %vm1210_vm6 = vcmp.eq.f32.partialorder %v1110_v18, inf  ;;  %vm1212_vm7 = vcmp.eq.f32.partialorder %v1110_v18, 0.0 }
 0x1c5   :  { %1425 = vst [vmem:[#allocation7 + $0x30] sm:$0xff] %v1393_v30  ;;  %v1188_v28 = vmul.f32 %v1943_v32, %v1107_v60  ;;  %v1394_v36 = vmin.f32 %v1362_v33, 10.0 }
 0x1c6   :  { %v1945_v0 = vpop.eup %1944 }
 0x1c7   :  { %v1190_v45 = vsel %vm1189_vm0, %v1107_v60, %v1188_v28  ;;  %v1060_v47 = vpop.permute.xlu0 %1059  ;;  %1426 = vst [vmem:[#allocation7 + $0x38] sm:$0xff] %v1394_v36  ;;  %v1195_v39 = vmul.f32 %v1945_v0, %v1108_v7 }
 0x1c8   :  { %v1193_v48 = vsel %vm1191_vm1, %v1192_v40, %v1190_v45  ;;  %v1111_v29 = vadd.f32 %v1060_v47, %v2160_v19 }
 0x1c9   :  { %v1363_v49 = vmax.f32 %v1193_v48, 0.0  ;;  %v1062_v53 = vpop.permute.xlu1 %1061  ;;  %v1197_v56 = vsel %vm1196_vm2, %v1108_v7, %v1195_v39 }
 0x1ca   :  { %1950 = vrsqrt.f32 %v1111_v29  ;;  %v1200_v55 = vsel %vm1198_vm3, %v1199_v5, %v1197_v56  ;;  %v1112_v59 = vadd.f32 %v1062_v53, %v2164_v24  ;;  %v1213_v24 = vand.u32 2147483648, %v1110_v18 }
 0x1cb   :  { %v1395_v54 = vmin.f32 %v1363_v49, 10.0  ;;  %v1364_v34 = vmax.f32 %v1200_v55, 0.0  ;;  %vm1217_vm8 = vcmp.eq.f32.partialorder %v1111_v29, inf  ;;  %v1220_v51 = vand.u32 2147483648, %v1111_v29 }
 0x1cc   :  { %v1947_v52 = vpop.eup %1946  ;;  %1952 = vrsqrt.f32 %v1112_v59  ;;  %vm1219_vm9 = vcmp.eq.f32.partialorder %v1111_v29, 0.0  ;;  %vm1224_vm10 = vcmp.eq.f32.partialorder %v1112_v59, inf  ;;  %vm1226_vm11 = vcmp.eq.f32.partialorder %v1112_v59, 0.0 }
 0x1cd   :  { %1427 = vst [vmem:[#allocation7 + $0x40] sm:$0xff] %v1395_v54  ;;  %v1202_v60 = vmul.f32 %v1947_v52, %v1109_v22  ;;  %v1396_v1 = vmin.f32 %v1364_v34, 10.0 }
 0x1ce   :  { %v1949_v19 = vpop.eup %1948 }
 0x1cf   :  { %v1204_v4 = vsel %vm1203_vm4, %v1109_v22, %v1202_v60  ;;  %v1064_v61 = vpop.permute.xlu0 %1063  ;;  %1428 = vst [vmem:[#allocation7 + $0x48] sm:$0xff] %v1396_v1  ;;  %v1209_v7 = vmul.f32 %v1949_v19, %v1110_v18 }
 0x1d0   :  { %v1207_v9 = vsel %vm1205_vm5, %v1206_v3, %v1204_v4  ;;  %v1113_v10 = vadd.f32 %v1064_v61, %v2168_v37 }
 0x1d1   :  { %v1365_v62 = vmax.f32 %v1207_v9, 0.0  ;;  %v1066_v11 = vpop.permute.xlu1 %1065  ;;  %v1211_v46 = vsel %vm1210_vm6, %v1110_v18, %v1209_v7 }
 0x1d2   :  { %1954 = vrsqrt.f32 %v1113_v10  ;;  %v1214_v16 = vsel %vm1212_vm7, %v1213_v24, %v1211_v46  ;;  %v1114_v20 = vadd.f32 %v1066_v11, %v2172_v42  ;;  %v1227_v42 = vand.u32 2147483648, %v1112_v59 }
 0x1d3   :  { %v1397_v15 = vmin.f32 %v1365_v62, 10.0  ;;  %v1366_v8 = vmax.f32 %v1214_v16, 0.0  ;;  %vm1231_vm12 = vcmp.eq.f32.partialorder %v1113_v10, inf  ;;  %vm1233_vm13 = vcmp.eq.f32.partialorder %v1113_v10, 0.0 }
 0x1d4   :  { %v1951_v13 = vpop.eup %1950  ;;  %1956 = vrsqrt.f32 %v1114_v20  ;;  %vm1238_vm14 = vcmp.eq.f32.partialorder %v1114_v20, inf  ;;  %vm1240_vm15 = vcmp.eq.f32.partialorder %v1114_v20, 0.0 }
 0x1d5   :  { %1429 = vst [vmem:[#allocation7 + $0x50] sm:$0xff] %v1397_v15  ;;  %v1216_v22 = vmul.f32 %v1951_v13, %v1111_v29  ;;  %v1398_v23 = vmin.f32 %v1366_v8, 10.0 }
 0x1d6   :  { %v1953_v37 = vpop.eup %1952 }
 0x1d7   :  { %v1218_v25 = vsel %vm1217_vm8, %v1111_v29, %v1216_v22  ;;  %v1068_v27 = vpop.permute.xlu0 %1067  ;;  %1430 = vst [vmem:[#allocation7 + $0x58] sm:$0xff] %v1398_v23  ;;  %v1223_v31 = vmul.f32 %v1953_v37, %v1112_v59  ;;  %v1234_v29 = vand.u32 2147483648, %v1113_v10 }
 0x1d8   :  { %v1221_v30 = vsel %vm1219_vm9, %v1220_v51, %v1218_v25  ;;  %v1115_v18 = vadd.f32 %v1068_v27, %v2176_v57 }
 0x1d9   :  { %v1367_v32 = vmax.f32 %v1221_v30, 0.0  ;;  %v1070_v33 = vpop.permute.xlu1 %1069  ;;  %v1225_v28 = vsel %vm1224_vm10, %v1112_v59, %v1223_v31 }
 0x1da   :  { %1958 = vrsqrt.f32 %v1115_v18  ;;  %v1228_v40 = vsel %vm1226_vm11, %v1227_v42, %v1225_v28  ;;  %v1116_v0 = vadd.f32 %v1070_v33, %v2180_v63  ;;  %v1241_v63 = vand.u32 2147483648, %v1114_v20 }
 0x1db   :  { %v1399_v36 = vmin.f32 %v1367_v32, 10.0  ;;  %v1368_v47 = vmax.f32 %v1228_v40, 0.0  ;;  %vm1245_vm0 = vcmp.eq.f32.partialorder %v1115_v18, inf  ;;  %v1248_v9 = vand.u32 2147483648, %v1115_v18 }
 0x1dc   :  { %v1955_v45 = vpop.eup %1954  ;;  %1960 = vrsqrt.f32 %v1116_v0  ;;  %vm1247_vm1 = vcmp.eq.f32.partialorder %v1115_v18, 0.0  ;;  %vm1252_vm2 = vcmp.eq.f32.partialorder %v1116_v0, inf  ;;  %vm1254_vm3 = vcmp.eq.f32.partialorder %v1116_v0, 0.0 }
 0x1dd   :  { %1431 = vst [vmem:[#allocation7 + $0x60] sm:$0xff] %v1399_v36  ;;  %v1230_v48 = vmul.f32 %v1955_v45, %v1113_v10  ;;  %v1400_v39 = vmin.f32 %v1368_v47, 10.0 }
 0x1de   :  { %v1957_v57 = vpop.eup %1956 }
 0x1df   :  { %v1232_v49 = vsel %vm1231_vm12, %v1113_v10, %v1230_v48  ;;  %v1072_v5 = vpop.permute.xlu0 %1071  ;;  %1432 = vst [vmem:[#allocation7 + $0x68] sm:$0xff] %v1400_v39  ;;  %v1237_v56 = vmul.f32 %v1957_v57, %v1114_v20 }
 0x1e0   :  { %v1235_v53 = vsel %vm1233_vm13, %v1234_v29, %v1232_v49  ;;  %v1117_v54 = vadd.f32 %v1072_v5, %v2184_v14 }
 0x1e1   :  { %v1369_v55 = vmax.f32 %v1235_v53, 0.0  ;;  %v1074_v59 = vpop.permute.xlu1 %1073  ;;  %v1239_v52 = vsel %vm1238_vm14, %v1114_v20, %v1237_v56 }
 0x1e2   :  { %1962 = vrsqrt.f32 %v1117_v54  ;;  %v1242_v60 = vsel %vm1240_vm15, %v1241_v63, %v1239_v52  ;;  %v1118_v1 = vadd.f32 %v1074_v59, %v2188_v21  ;;  %v1255_v21 = vand.u32 2147483648, %v1116_v0 }
 0x1e3   :  { %v1401_v34 = vmin.f32 %v1369_v55, 10.0  ;;  %v1370_v19 = vmax.f32 %v1242_v60, 0.0  ;;  %vm1259_vm4 = vcmp.eq.f32.partialorder %v1117_v54, inf  ;;  %v1262_v25 = vand.u32 2147483648, %v1117_v54 }
 0x1e4   :  { %v1959_v3 = vpop.eup %1958  ;;  %1964 = vrsqrt.f32 %v1118_v1  ;;  %vm1261_vm5 = vcmp.eq.f32.partialorder %v1117_v54, 0.0  ;;  %vm1266_vm6 = vcmp.eq.f32.partialorder %v1118_v1, inf  ;;  %vm1268_vm7 = vcmp.eq.f32.partialorder %v1118_v1, 0.0 }
 0x1e5   :  { %1433 = vst [vmem:[#allocation7 + $0x70] sm:$0xff] %v1401_v34  ;;  %v1244_v4 = vmul.f32 %v1959_v3, %v1115_v18  ;;  %v1402_v61 = vmin.f32 %v1370_v19, 10.0 }
 0x1e6   :  { %v1961_v14 = vpop.eup %1960 }
 0x1e7   :  { %v1246_v7 = vsel %vm1245_vm0, %v1115_v18, %v1244_v4  ;;  %v1076_v10 = vpop.permute.xlu0 %1075  ;;  %1434 = vst [vmem:[#allocation7 + $0x78] sm:$0xff] %v1402_v61  ;;  %v1251_v24 = vmul.f32 %v1961_v14, %v1116_v0 }
 0x1e8   :  { %v1249_v62 = vsel %vm1247_vm1, %v1248_v9, %v1246_v7  ;;  %v1119_v11 = vadd.f32 %v1076_v10, %v2192_v35 }
 0x1e9   :  { %v1371_v46 = vmax.f32 %v1249_v62, 0.0  ;;  %v1078_v15 = vpop.permute.xlu1 %1077  ;;  %v1253_v16 = vsel %vm1252_vm2, %v1116_v0, %v1251_v24 }
 0x1ea   :  { %1966 = vrsqrt.f32 %v1119_v11  ;;  %v1256_v13 = vsel %vm1254_vm3, %v1255_v21, %v1253_v16  ;;  %v1120_v8 = vadd.f32 %v1078_v15, %v2196_v41  ;;  %v1269_v41 = vand.u32 2147483648, %v1118_v1 }
 0x1eb   :  { %v1403_v20 = vmin.f32 %v1371_v46, 10.0  ;;  %v1372_v23 = vmax.f32 %v1256_v13, 0.0  ;;  %vm1273_vm8 = vcmp.eq.f32.partialorder %v1119_v11, inf  ;;  %v1276_v29 = vand.u32 2147483648, %v1119_v11 }
 0x1ec   :  { %v1963_v22 = vpop.eup %1962  ;;  %1968 = vrsqrt.f32 %v1120_v8  ;;  %vm1275_vm9 = vcmp.eq.f32.partialorder %v1119_v11, 0.0  ;;  %vm1280_vm10 = vcmp.eq.f32.partialorder %v1120_v8, inf  ;;  %vm1282_vm11 = vcmp.eq.f32.partialorder %v1120_v8, 0.0 }
 0x1ed   :  { %1435 = vst [vmem:[#allocation7 + $0x80] sm:$0xff] %v1403_v20  ;;  %v1258_v51 = vmul.f32 %v1963_v22, %v1117_v54  ;;  %v1404_v37 = vmin.f32 %v1372_v23, 10.0 }
 0x1ee   :  { %v1965_v35 = vpop.eup %1964 }
 0x1ef   :  { %v1260_v27 = vsel %vm1259_vm4, %v1117_v54, %v1258_v51  ;;  %v1080_v30 = vpop.permute.xlu0 %1079  ;;  %1436 = vst [vmem:[#allocation7 + $0x88] sm:$0xff] %v1404_v37  ;;  %v1265_v18 = vmul.f32 %v1965_v35, %v1118_v1 }
 0x1f0   :  { %v1263_v31 = vsel %vm1261_vm5, %v1262_v25, %v1260_v27  ;;  %v1121_v32 = vadd.f32 %v1080_v30, %v2200_v58 }
 0x1f1   :  { %v1373_v42 = vmax.f32 %v1263_v31, 0.0  ;;  %v1082_v33 = vpop.permute.xlu1 %1081  ;;  %v1267_v28 = vsel %vm1266_vm6, %v1118_v1, %v1265_v18 }
 0x1f2   :  { %1970 = vrsqrt.f32 %v1121_v32  ;;  %v1270_v40 = vsel %vm1268_vm7, %v1269_v41, %v1267_v28  ;;  %v1122_v0 = vadd.f32 %v1082_v33, %v2204_v2  ;;  %v1283_v2 = vand.u32 2147483648, %v1120_v8 }
 0x1f3   :  { %v1405_v36 = vmin.f32 %v1373_v42, 10.0  ;;  %v1374_v47 = vmax.f32 %v1270_v40, 0.0  ;;  %vm1287_vm12 = vcmp.eq.f32.partialorder %v1121_v32, inf  ;;  %v1290_v4 = vand.u32 2147483648, %v1121_v32 }
 0x1f4   :  { %v1967_v45 = vpop.eup %1966  ;;  %1972 = vrsqrt.f32 %v1122_v0  ;;  %vm1289_vm13 = vcmp.eq.f32.partialorder %v1121_v32, 0.0  ;;  %vm1294_vm14 = vcmp.eq.f32.partialorder %v1122_v0, inf  ;;  %vm1296_vm15 = vcmp.eq.f32.partialorder %v1122_v0, 0.0 }
 0x1f5   :  { %1437 = vst [vmem:[#allocation7 + $0x90] sm:$0xff] %v1405_v36  ;;  %v1272_v48 = vmul.f32 %v1967_v45, %v1119_v11  ;;  %v1406_v39 = vmin.f32 %v1374_v47, 10.0 }
 0x1f6   :  { %v1969_v58 = vpop.eup %1968 }
 0x1f7   :  { %v1274_v57 = vsel %vm1273_vm8, %v1119_v11, %v1272_v48  ;;  %v1084_v49 = vpop.permute.xlu0 %1083  ;;  %1438 = vst [vmem:[#allocation7 + $0x98] sm:$0xff] %v1406_v39  ;;  %v1279_v53 = vmul.f32 %v1969_v58, %v1120_v8 }
 0x1f8   :  { %v1277_v5 = vsel %vm1275_vm9, %v1276_v29, %v1274_v57  ;;  %v1123_v56 = vadd.f32 %v1084_v49, %v2208_v17 }
 0x1f9   :  { %v1375_v54 = vmax.f32 %v1277_v5, 0.0  ;;  %v1086_v55 = vpop.permute.xlu1 %1085  ;;  %v1281_v63 = vsel %vm1280_vm10, %v1120_v8, %v1279_v53 }
 0x1fa   :  { %1974 = vrsqrt.f32 %v1123_v56  ;;  %v1284_v52 = vsel %vm1282_vm11, %v1283_v2, %v1281_v63  ;;  %v1124_v34 = vadd.f32 %v1086_v55, %v2212_v26  ;;  %v1297_v26 = vand.u32 2147483648, %v1122_v0 }
 0x1fb   :  { %v1407_v59 = vmin.f32 %v1375_v54, 10.0  ;;  %v1376_v1 = vmax.f32 %v1284_v52, 0.0  ;;  %vm1301_vm0 = vcmp.eq.f32.partialorder %v1123_v56, inf  ;;  %v1304_v22 = vand.u32 2147483648, %v1123_v56 }
 0x1fc   :  { %v1971_v60 = vpop.eup %1970  ;;  %1976 = vrsqrt.f32 %v1124_v34  ;;  %vm1303_vm1 = vcmp.eq.f32.partialorder %v1123_v56, 0.0  ;;  %vm1308_vm2 = vcmp.eq.f32.partialorder %v1124_v34, inf  ;;  %vm1310_vm3 = vcmp.eq.f32.partialorder %v1124_v34, 0.0 }
 0x1fd   :  { %1439 = vst [vmem:[#allocation7 + $0xa0] sm:$0xff] %v1407_v59  ;;  %v1286_v3 = vmul.f32 %v1971_v60, %v1121_v32  ;;  %v1408_v19 = vmin.f32 %v1376_v1, 10.0 }
 0x1fe   :  { %v1973_v17 = vpop.eup %1972 }
 0x1ff   :  { %v1288_v61 = vsel %vm1287_vm12, %v1121_v32, %v1286_v3  ;;  %v1088_v9 = vpop.permute.xlu0 %1087  ;;  %1440 = vst [vmem:[#allocation7 + $0xa8] sm:$0xff] %v1408_v19  ;;  %v1293_v7 = vmul.f32 %v1973_v17, %v1122_v0 }
 0x200   :  { %v1291_v14 = vsel %vm1289_vm13, %v1290_v4, %v1288_v61  ;;  %v1125_v10 = vadd.f32 %v1088_v9, %v2216_v43 }
 0x201   :  { %v1377_v62 = vmax.f32 %v1291_v14, 0.0  ;;  %v1090_v24 = vpop.permute.xlu1 %1089  ;;  %v1295_v11 = vsel %vm1294_vm14, %v1122_v0, %v1293_v7 }
 0x202   :  { %1978 = vrsqrt.f32 %v1125_v10  ;;  %v1298_v21 = vsel %vm1296_vm15, %v1297_v26, %v1295_v11  ;;  %v1126_v15 = vadd.f32 %v1090_v24, %v2220_v50  ;;  %v1311_v50 = vand.u32 2147483648, %v1124_v34 }
 0x203   :  { %v1409_v46 = vmin.f32 %v1377_v62, 10.0  ;;  %v1378_v20 = vmax.f32 %v1298_v21, 0.0  ;;  %vm1315_vm4 = vcmp.eq.f32.partialorder %v1125_v10, inf  ;;  %v1318_v40 = vand.u32 2147483648, %v1125_v10 }
 0x204   :  { %v1975_v16 = vpop.eup %1974  ;;  %1980 = vrsqrt.f32 %v1126_v15  ;;  %vm1317_vm5 = vcmp.eq.f32.partialorder %v1125_v10, 0.0  ;;  %vm1322_vm6 = vcmp.eq.f32.partialorder %v1126_v15, inf  ;;  %vm1324_vm7 = vcmp.eq.f32.partialorder %v1126_v15, 0.0 }
 0x205   :  { %1441 = vst [vmem:[#allocation7 + $0xb0] sm:$0xff] %v1409_v46  ;;  %v1300_v13 = vmul.f32 %v1975_v16, %v1123_v56  ;;  %v1410_v8 = vmin.f32 %v1378_v20, 10.0 }
 0x206   :  { %v1977_v43 = vpop.eup %1976 }
 0x207   :  { %v1302_v23 = vsel %vm1301_vm0, %v1123_v56, %v1300_v13  ;;  %v1092_v51 = vpop.permute.xlu0 %1091  ;;  %1442 = vst [vmem:[#allocation7 + $0xb8] sm:$0xff] %v1410_v8  ;;  %v1307_v25 = vmul.f32 %v1977_v43, %v1124_v34 }
 0x208   :  { %v1305_v37 = vsel %vm1303_vm1, %v1304_v22, %v1302_v23  ;;  %v1127_v35 = vadd.f32 %v1092_v51, %v2224_v6 }
 0x209   :  { %v1379_v27 = vmax.f32 %v1305_v37, 0.0  ;;  %v1094_v30 = vpop.permute.xlu1 %1093  ;;  %v1309_v31 = vsel %vm1308_vm2, %v1124_v34, %v1307_v25 }
 0x20a   :  { %1982 = vrsqrt.f32 %v1127_v35  ;;  %v1312_v32 = vsel %vm1310_vm3, %v1311_v50, %v1309_v31  ;;  %v1128_v42 = vadd.f32 %v1094_v30, %v2228_v12  ;;  %v1325_v12 = vand.u32 2147483648, %v1126_v15 }
 0x20b   :  { %v1411_v18 = vmin.f32 %v1379_v27, 10.0  ;;  %v1380_v33 = vmax.f32 %v1312_v32, 0.0  ;;  %vm1329_vm8 = vcmp.eq.f32.partialorder %v1127_v35, inf  ;;  %v1332_v63 = vand.u32 2147483648, %v1127_v35 }
 0x20c   :  { %v1979_v41 = vpop.eup %1978  ;;  %1984 = vrsqrt.f32 %v1128_v42  ;;  %vm1331_vm9 = vcmp.eq.f32.partialorder %v1127_v35, 0.0  ;;  %vm1336_vm10 = vcmp.eq.f32.partialorder %v1128_v42, inf  ;;  %v1339_v1 = vand.u32 2147483648, %v1128_v42 }
 0x20d   :  { %1443 = vst [vmem:[#allocation7 + $0xc0] sm:$0xff] %v1411_v18  ;;  %v1314_v28 = vmul.f32 %v1979_v41, %v1125_v10  ;;  %v1412_v36 = vmin.f32 %v1380_v33, 10.0  ;;  %vm1338_vm11 = vcmp.eq.f32.partialorder %v1128_v42, 0.0 }
 0x20e   :  { %v1981_v6 = vpop.eup %1980 }
 0x20f   :  { %v1316_v0 = vsel %vm1315_vm4, %v1125_v10, %v1314_v28  ;;  %v1096_v45 = vpop.permute.xlu0 %1095  ;;  %1444 = vst [vmem:[#allocation7 + $0xc8] sm:$0xff] %v1412_v36  ;;  %v1321_v48 = vmul.f32 %v1981_v6, %v1126_v15 }
 0x210   :  { %v1319_v47 = vsel %vm1317_vm5, %v1318_v40, %v1316_v0  ;;  %v1129_v39 = vadd.f32 %v1096_v45, %v2233_v38 }
 0x211   :  { %v1381_v29 = vmax.f32 %v1319_v47, 0.0  ;;  %v1098_v58 = vpop.permute.xlu1 %1097  ;;  %v1323_v57 = vsel %vm1322_vm6, %v1126_v15, %v1321_v48 }
 0x212   :  { %1986 = vrsqrt.f32 %v1129_v39  ;;  %v1326_v5 = vsel %vm1324_vm7, %v1325_v12, %v1323_v57  ;;  %v1130_v53 = vadd.f32 %v1098_v58, %v2238_v44  ;;  %vm1343_vm12 = vcmp.eq.f32.partialorder %v1129_v39, inf }
 0x213   :  { %v1413_v49 = vmin.f32 %v1381_v29, 10.0  ;;  %v1382_v54 = vmax.f32 %v1326_v5, 0.0  ;;  %v1346_v14 = vand.u32 2147483648, %v1129_v39  ;;  %vm1345_vm13 = vcmp.eq.f32.partialorder %v1129_v39, 0.0 }
 0x214   :  { %v1983_v56 = vpop.eup %1982  ;;  %1988 = vrsqrt.f32 %v1130_v53  ;;  %vm1350_vm14 = vcmp.eq.f32.partialorder %v1130_v53, inf  ;;  %v1353_v11 = vand.u32 2147483648, %v1130_v53  ;;  %vm1352_vm15 = vcmp.eq.f32.partialorder %v1130_v53, 0.0 }
 0x215   :  { %1445 = vst [vmem:[#allocation7 + $0xd0] sm:$0xff] %v1413_v49  ;;  %v1328_v2 = vmul.f32 %v1983_v56, %v1127_v35  ;;  %v1414_v55 = vmin.f32 %v1382_v54, 10.0 }
 0x216   :  { %v1985_v38 = vpop.eup %1984 }
 0x217   :  { %v1330_v59 = vsel %vm1329_vm8, %v1127_v35, %v1328_v2  ;;  %1446 = vst [vmem:[#allocation7 + $0xd8] sm:$0xff] %v1414_v55  ;;  %v1335_v34 = vmul.f32 %v1985_v38, %v1128_v42 }
 0x218   :  { %v1333_v52 = vsel %vm1331_vm9, %v1332_v63, %v1330_v59 }
 0x219   :  { %v1383_v60 = vmax.f32 %v1333_v52, 0.0  ;;  %v1337_v3 = vsel %vm1336_vm10, %v1128_v42, %v1335_v34 }
 0x21a   :  { %v1340_v19 = vsel %vm1338_vm11, %v1339_v1, %v1337_v3 }
 0x21b   :  { %v1415_v44 = vmin.f32 %v1383_v60, 10.0  ;;  %v1384_v17 = vmax.f32 %v1340_v19, 0.0 }
 0x21c   :  { %v1987_v4 = vpop.eup %1986 }
 0x21d   :  { %1447 = vst [vmem:[#allocation7 + $0xe0] sm:$0xff] %v1415_v44  ;;  %v1342_v61 = vmul.f32 %v1987_v4, %v1129_v39  ;;  %v1416_v9 = vmin.f32 %v1384_v17, 10.0 }
 0x21e   :  { %v1989_v7 = vpop.eup %1988 }
 0x21f   :  { %v1344_v10 = vsel %vm1343_vm12, %v1129_v39, %v1342_v61  ;;  %1448 = vst [vmem:[#allocation7 + $0xe8] sm:$0xff] %v1416_v9  ;;  %v1349_v26 = vmul.f32 %v1989_v7, %v1130_v53 }
 0x220   :  { %v1347_v62 = vsel %vm1345_vm13, %v1346_v14, %v1344_v10 }
 0x221   :  { %v1385_v24 = vmax.f32 %v1347_v62, 0.0  ;;  %v1351_v46 = vsel %vm1350_vm14, %v1130_v53, %v1349_v26 }
 0x222   :  { %v1354_v15 = vsel %vm1352_vm15, %v1353_v11, %v1351_v46 }
 0x223   :  { %v1417_v21 = vmin.f32 %v1385_v24, 10.0  ;;  %v1386_v16 = vmax.f32 %v1354_v15, 0.0 }
 0x225   :  { %1449 = vst [vmem:[#allocation7 + $0xf0] sm:$0xff] %v1417_v21  ;;  %v1418_v20 = vmin.f32 %v1386_v16, 10.0 }
 0x227   :  { %1450 = vst [vmem:[#allocation7 + $0xf8] sm:$0xff] %v1418_v20 }
 0x228   :  { %2045 = shalt.err (!%p2042_p6)
}
 0x229   :  { %s2046_s12 = scalar_lea.hbm %s2286_s2, 4096 }
 0x22a   :  { %p2047_p7 = scmp.ne.s32.totalorder %s2286_s2, %s2046_s12  ;;  %p2050_p8 = scmp.lt.u32.totalorder %s2046_s12, %s2286_s2 }
 0x22c   :  { %p2052_p9 = pnand %p2050_p8, %p2047_p7 }
 0x22e   :  { %2055 = shalt.err (!%p2052_p9)
}
 0x22f   :  { %s2069_s17 = smov 128   ;;  %s2070_s18 = smov 8  }
 0x230   :  { %1462 = dma.vmem_to_hbm [thread:$0]  %s1457_s8, 4096, %s2286_s2, [#allocation4], %s2069_s17, %s2069_s17, %s2070_s18  }
 0x231   :  { %2060 = dma.done.wait [#allocation4], 4096  }
 0x232   :  { %2061 = vsyncadd [#allocation4], 4294963200 }
 0x233   :  { %1466 = vsyncpa [#allocation3], 1 }
 0x234   :  { %1467 = vsyncpa [#allocation6], 1 }
 0x235   :  { %1468 = vsyncpa [#allocation4], 1 }

</bundles_post_ra>
